<compile_context>
chip_gen: v7x
topology: tpu7x:2x2x1
jax: 0.10.0
libtpu: 0.0.40
codegen_flags: <defaults>
</compile_context>

<pallas_src>
import functools

import jax
import jax.numpy as jnp
from jax.experimental import pallas as pl
from jax.experimental.pallas import tpu as pltpu

IGNORE_LABEL = -1
BALANCE_WEIGHTS = (1.0,)          # config.LOSS.BALANCE_WEIGHTS with NUM_OUTPUTS == 1

LANES = 128                       # lane width (fixed by hardware)
ROWS_CHUNK = 8                    # sublane-tile rows processed per inner-loop step
LOGITS_BLOCK_BYTES = 4 * 1024 * 1024   # ~2-4 MiB of logits per grid step (roofline win)
MIN_GRID_STEPS = 8                # keep megacore (v7x: 2 TCs) fed
VMEM_LIMIT_BYTES = 32 * 1024 * 1024    # explicit scoped-VMEM limit; blocks budgeted well below


def _cdiv(a, b):
    return -(-a // b)


def _round_up(a, b):
    return _cdiv(a, b) * b


def _ce_kernel(logits_ref, target_ref, out_ref, *,
               rows_chunk, n_chunks, rows_tile, total_rows,
               ignore_label, mask_tail, unroll):
    """Per grid step: (C, rows_tile, 128) logits block -> (2, rows_chunk, 128) partials."""
    c = logits_ref.shape[0]
    row_base = pl.program_id(1) * rows_tile

    # Loop-invariant iotas, hoisted once (JAX does not CSE broadcast_in_dim).
    cls = jax.lax.broadcasted_iota(jnp.int32, (c, rows_chunk, LANES), 0)
    local_row = (jax.lax.broadcasted_iota(jnp.int32, (rows_chunk, LANES), 0)
                 if mask_tail else None)

    def chunk(x_raw, tgt, row_off):
        # x_raw: (C, rows_chunk, 128) input dtype; tgt: (rows_chunk, 128) int32
        x = x_raw.astype(jnp.float32)                     # f32 math path (v5e-safe)
        valid = tgt != ignore_label
        if mask_tail:                                     # static: only for grid overhang
            valid = valid & ((row_base + row_off + local_row) < total_rows)
        # Class reduction = elementwise max/sum across the C leading slices (full vregs).
        m = jnp.max(x, axis=0)                            # (rows_chunk, 128)
        p = jnp.exp(x - m[None, :, :])
        s = jnp.sum(p, axis=0)
        lse = m + jnp.log(s)
        # Target-class logit via select-accumulate (no float one-hot / MXU).
        picked = jnp.sum(jnp.where(cls == tgt[None, :, :], x, 0.0), axis=0)
        loss = jnp.where(valid, lse - picked, 0.0)
        return loss, valid.astype(jnp.float32)

    zeros = jnp.zeros((rows_chunk, LANES), jnp.float32)

    if n_chunks == 1:
        # rows_tile == rows_chunk: process the whole block at once (static full read).
        loss_acc, count_acc = chunk(logits_ref[...], target_ref[...], 0)
    else:
        def body(k, carry):
            loss_acc, count_acc = carry
            off = pl.multiple_of(k * rows_chunk, rows_chunk)
            x = logits_ref[:, pl.ds(off, rows_chunk), :]
            tgt = target_ref[pl.ds(off, rows_chunk), :]
            l, cnt = chunk(x, tgt, off)
            return loss_acc + l, count_acc + cnt

        loss_acc, count_acc = jax.lax.fori_loop(
            0, n_chunks, body, (zeros, zeros), unroll=unroll)

    # Merged output block: one store for (loss, count) partial sums.
    out_ref[0, :, :] = loss_acc
    out_ref[1, :, :] = count_acc


def _ce_loss_single(score_nchw, target_nhw, *, ignore_label=IGNORE_LABEL):
    """CrossEntropyLoss(ignore_index=ignore_label, reduction='mean') for one score head."""
    n, c, h, w = score_nchw.shape
    assert target_nhw.shape == (n, h, w), "spatial sizes must match (no interpolate)"
    hw = h * w

    # Free views of contiguous NCHW (no HBM transpose): (N, C, HW) and (N, HW).
    # NOTE: do NOT upcast the score here — bf16 inputs stay bf16 on the HBM stream.
    logits = score_nchw.reshape(n, c, hw)
    target = target_nhw.reshape(n, hw).astype(jnp.int32)

    hw_pad = _round_up(hw, LANES)
    if hw_pad != hw:
        # TODO(synk): rare fallback (HW not a multiple of 128) costs one HBM pad pass;
        # typical segmentation shapes never take it.  Padded pixels get ignore_label.
        logits = jnp.pad(logits, ((0, 0), (0, 0), (0, hw_pad - hw)))
        target = jnp.pad(target, ((0, 0), (0, hw_pad - hw)), constant_values=ignore_label)
    r = hw_pad // LANES

    # Free reshapes to the lane-dense (rows, 128) pixel layout.
    logits = logits.reshape(n, c, r, LANES)
    target = target.reshape(n, r, LANES)

    itemsize = jnp.dtype(score_nchw.dtype).itemsize

    # --- tile sizing -----------------------------------------------------------------
    if r < ROWS_CHUNK:
        rows_chunk = r                                   # tiny image: single full block
        rows_tile = r
    else:
        rows_chunk = ROWS_CHUNK
        rows_cap = (r // ROWS_CHUNK) * ROWS_CHUNK        # largest multiple of 8 <= r
        # Byte-budgeted block: ~LOGITS_BLOCK_BYTES of logits per grid step.
        rows_budget = max(ROWS_CHUNK,
                          (LOGITS_BLOCK_BYTES // (c * LANES * itemsize))
                          // ROWS_CHUNK * ROWS_CHUNK)
        rows_tile = min(rows_budget, rows_cap)
        # Keep enough grid steps so both v7x TensorCores get work.
        want_tiles = _cdiv(MIN_GRID_STEPS, n)
        if _cdiv(r, rows_tile) < want_tiles:
            rows_tile = min(rows_tile,
                            max(ROWS_CHUNK, _round_up(_cdiv(r, want_tiles), ROWS_CHUNK)))

    n_chunks = rows_tile // rows_chunk
    n_row_tiles = _cdiv(r, rows_tile)
    mask_tail = (n_row_tiles * rows_tile) != r
    unroll = 4 if n_chunks % 4 == 0 else (2 if n_chunks % 2 == 0 else 1)

    kernel = functools.partial(
        _ce_kernel, rows_chunk=rows_chunk, n_chunks=n_chunks, rows_tile=rows_tile,
        total_rows=r, ignore_label=ignore_label, mask_tail=mask_tail, unroll=unroll)

    part = pl.pallas_call(
        kernel,
        out_shape=jax.ShapeDtypeStruct((n, n_row_tiles, 2, rows_chunk, LANES), jnp.float32),
        grid_spec=pltpu.PrefetchScalarGridSpec(
            num_scalar_prefetch=0,
            grid=(n, n_row_tiles),
            in_specs=[
                # (C, rows_tile, 128): pixels fill full (8,128) vregs, classes on leading dim
                pl.BlockSpec((None, c, rows_tile, LANES), lambda b, j: (b, 0, j, 0)),
                # (rows_tile, 128): lane/sublane-dense targets
                pl.BlockSpec((None, rows_tile, LANES), lambda b, j: (b, j, 0)),
            ],
            # merged (loss, count) partial-sum block
            out_specs=pl.BlockSpec((None, None, 2, rows_chunk, LANES),
                                   lambda b, j: (b, j, 0, 0, 0)),
        ),
        compiler_params=pltpu.CompilerParams(
            dimension_semantics=("parallel", "parallel"),
            vmem_limit_bytes=VMEM_LIMIT_BYTES),
    )(logits, target)

    loss_sum = jnp.sum(part[:, :, 0])
    count = jnp.sum(part[:, :, 1])
    # mean over valid pixels (matches nn.CrossEntropyLoss 'mean' with ignore_index);
    # note: all-ignored input returns 0.0 here rather than PyTorch's NaN (intended).
    return loss_sum / jnp.maximum(count, 1.0)


def cross_entropy_forward(scores, target):
    """Replicates CrossEntropy.forward: weighted sum of per-head CE losses."""
    if not isinstance(scores, (list, tuple)):
        scores = [scores]
    assert len(BALANCE_WEIGHTS) == len(scores)
    total = 0.0
    for w_, s in zip(BALANCE_WEIGHTS, scores):
        total = total + w_ * _ce_loss_single(s, target)
    return total


def _ce_reference(score, target, *, ignore_label=IGNORE_LABEL):
    """Pure-JAX reference for the single-head loss (sanity check)."""
    n, c, h, w = score.shape
    logits = jnp.transpose(score, (0, 2, 3, 1)).reshape(-1, c).astype(jnp.float32)
    tgt = target.reshape(-1)
    valid = tgt != ignore_label
    lse = jax.scipy.special.logsumexp(logits, axis=-1)
    idx = jnp.maximum(tgt, 0).astype(jnp.int32)[:, None]
    picked = jnp.take_along_axis(logits, idx, axis=-1)[:, 0]
    per_pix = jnp.where(valid, lse - picked, 0.0)
    return jnp.sum(per_pix) / jnp.maximum(jnp.sum(valid.astype(jnp.float32)), 1.0)


if __name__ == "__main__":
    key = jax.random.PRNGKey(0)
    k_score, k_tgt, k_ign = jax.random.split(key, 3)

    N, C, H, W = 2, 4, 16, 16
    score = jax.random.normal(k_score, (N, C, H, W), dtype=jnp.float32)
    target = jax.random.randint(k_tgt, (N, H, W), 0, C, dtype=jnp.int32)
    # sprinkle in some ignored pixels
    ignore_mask = jax.random.bernoulli(k_ign, 0.1, (N, H, W))
    target = jnp.where(ignore_mask, IGNORE_LABEL, target)

    loss = cross_entropy_forward(score, target)
    jax.block_until_ready(loss)

    ref = _ce_reference(score, target)
    assert jnp.allclose(loss, ref, rtol=1e-4, atol=1e-4), (loss, ref)

    print("KERNEL_OK")
</pallas_src>

<mosaic_0001>
module attributes {stable_mosaic.version = 11 : i64} {
  func.func @_ce_kernel(%arg0: i32, %arg1: i32, %arg2: memref<1x4x2x128xf32, #tpu.memory_space<vmem>>, %arg3: memref<1x2x128xi32, #tpu.memory_space<vmem>>, %arg4: memref<1x1x2x2x128xf32, #tpu.memory_space<vmem>>) attributes {dimension_semantics = [#tpu.dimension_semantics<parallel>, #tpu.dimension_semantics<parallel>], iteration_bounds = array<i64: 2, 1>, scalar_prefetch = 0 : i64, scratch_operands = 0 : i64, tpu.core_type = #tpu.core_type<tc>, window_params = [{transform_indices = @transform_0, window_bounds = array<i64: 1, 4, 2, 128>}, {transform_indices = @transform_1, window_bounds = array<i64: 1, 2, 128>}, {transform_indices = @transform_2, window_bounds = array<i64: 1, 1, 2, 2, 128>}]} {
    %0 = tpu.iota {dimensions = array<i32: 0>} : vector<4x2x128xi32>
    %c0 = arith.constant 0 : index
    %c0_0 = arith.constant 0 : index
    %c0_1 = arith.constant 0 : index
    %c0_2 = arith.constant 0 : index
    %1 = vector.load %arg2[%c0, %c0_0, %c0_1, %c0_2] : memref<1x4x2x128xf32, #tpu.memory_space<vmem>>, vector<1x4x2x128xf32>
    %2 = vector.shape_cast %1 : vector<1x4x2x128xf32> to vector<4x2x128xf32>
    %c0_3 = arith.constant 0 : index
    %c0_4 = arith.constant 0 : index
    %c0_5 = arith.constant 0 : index
    %3 = vector.load %arg3[%c0_3, %c0_4, %c0_5] : memref<1x2x128xi32, #tpu.memory_space<vmem>>, vector<1x2x128xi32>
    %4 = vector.shape_cast %3 : vector<1x2x128xi32> to vector<2x128xi32>
    %c-1_i32 = arith.constant -1 : i32
    %5 = vector.broadcast %c-1_i32 : i32 to vector<2x128xi32>
    %6 = arith.cmpi ne, %4, %5 : vector<2x128xi32>
    %cst = arith.constant dense<0xFF800000> : vector<2x128xf32>
    %7 = vector.multi_reduction <maximumf>, %2, %cst [0] : vector<4x2x128xf32> to vector<2x128xf32>
    %8 = vector.shape_cast %7 : vector<2x128xf32> to vector<1x2x128xf32>
    %9 = vector.broadcast %8 : vector<1x2x128xf32> to vector<4x2x128xf32>
    %10 = arith.subf %2, %9 : vector<4x2x128xf32>
    %11 = math.exp %10 : vector<4x2x128xf32>
    %cst_6 = arith.constant dense<0.000000e+00> : vector<2x128xf32>
    %12 = vector.multi_reduction <add>, %11, %cst_6 [0] : vector<4x2x128xf32> to vector<2x128xf32>
    %13 = math.log %12 : vector<2x128xf32>
    %14 = arith.addf %7, %13 : vector<2x128xf32>
    %15 = vector.shape_cast %4 : vector<2x128xi32> to vector<1x2x128xi32>
    %16 = vector.broadcast %15 : vector<1x2x128xi32> to vector<4x2x128xi32>
    %17 = arith.cmpi eq, %0, %16 : vector<4x2x128xi32>
    %cst_7 = arith.constant 0.000000e+00 : f32
    %18 = vector.broadcast %cst_7 : f32 to vector<4x2x128xf32>
    %19 = arith.select %17, %2, %18 : vector<4x2x128xi1>, vector<4x2x128xf32>
    %cst_8 = arith.constant dense<0.000000e+00> : vector<2x128xf32>
    %20 = vector.multi_reduction <add>, %19, %cst_8 [0] : vector<4x2x128xf32> to vector<2x128xf32>
    %21 = arith.subf %14, %20 : vector<2x128xf32>
    %cst_9 = arith.constant 0.000000e+00 : f32
    %22 = vector.broadcast %cst_9 : f32 to vector<2x128xf32>
    %23 = arith.select %6, %21, %22 : vector<2x128xi1>, vector<2x128xf32>
    %24 = arith.extui %6 : vector<2x128xi1> to vector<2x128xi32>
    %25 = arith.sitofp %24 : vector<2x128xi32> to vector<2x128xf32>
    %c0_10 = arith.constant 0 : index
    %c0_11 = arith.constant 0 : index
    %c0_12 = arith.constant 0 : index
    %c0_13 = arith.constant 0 : index
    %c0_14 = arith.constant 0 : index
    %26 = vector.load %arg4[%c0_10, %c0_11, %c0_12, %c0_13, %c0_14] : memref<1x1x2x2x128xf32, #tpu.memory_space<vmem>>, vector<1x1x1x2x128xf32>
    %27 = vector.shape_cast %26 : vector<1x1x1x2x128xf32> to vector<2x128xf32>
    %28 = vector.shape_cast %23 : vector<2x128xf32> to vector<1x1x1x2x128xf32>
    tpu.vector_store %arg4[%c0_10, %c0_11, %c0_12, %c0_13, %c0_14], %28 {strides = array<i32>} : memref<1x1x2x2x128xf32, #tpu.memory_space<vmem>>, vector<1x1x1x2x128xf32>,
    %c0_15 = arith.constant 0 : index
    %c0_16 = arith.constant 0 : index
    %c1 = arith.constant 1 : index
    %c0_17 = arith.constant 0 : index
    %c0_18 = arith.constant 0 : index
    %29 = vector.load %arg4[%c0_15, %c0_16, %c1, %c0_17, %c0_18] : memref<1x1x2x2x128xf32, #tpu.memory_space<vmem>>, vector<1x1x1x2x128xf32>
    %30 = vector.shape_cast %29 : vector<1x1x1x2x128xf32> to vector<2x128xf32>
    %31 = vector.shape_cast %25 : vector<2x128xf32> to vector<1x1x1x2x128xf32>
    tpu.vector_store %arg4[%c0_15, %c0_16, %c1, %c0_17, %c0_18], %31 {strides = array<i32>} : memref<1x1x2x2x128xf32, #tpu.memory_space<vmem>>, vector<1x1x1x2x128xf32>,
    return
  }
  func.func @transform_0(%arg0: i32, %arg1: i32) -> (i32, i32, i32, i32) {
    %c0_i32 = arith.constant 0 : i32
    %c0_i32_0 = arith.constant 0 : i32
    %c0_i32_1 = arith.constant 0 : i32
    return %arg0, %c0_i32, %arg1, %c0_i32_0 : i32, i32, i32, i32
  }
  func.func @transform_1(%arg0: i32, %arg1: i32) -> (i32, i32, i32) {
    %c0_i32 = arith.constant 0 : i32
    %c0_i32_0 = arith.constant 0 : i32
    return %arg0, %arg1, %c0_i32 : i32, i32, i32
  }
  func.func @transform_2(%arg0: i32, %arg1: i32) -> (i32, i32, i32, i32, i32) {
    %c0_i32 = arith.constant 0 : i32
    %c0_i32_0 = arith.constant 0 : i32
    %c0_i32_1 = arith.constant 0 : i32
    %c0_i32_2 = arith.constant 0 : i32
    return %arg0, %arg1, %c0_i32, %c0_i32_0, %c0_i32_1 : i32, i32, i32, i32, i32
  }
}

</mosaic_0001>

<bundles_post_ra>
// kernel: tpu_custom_call.1
= control target key start
LH: loop header
LB: loop body
LE: loop exit
PB: predicated region body
PF: predicated region fallthrough
CT: control target
= control target key end

     0   :  { %7 = vsyncpa [#allocation3], 0  ;;  %s915_s0 = inlined_call_operand.hbm [shape: f32[2,4,2,128], index: 0, kind: input, shape index: {}]   ;;  %s916_s1 = inlined_call_operand.hbm [shape: s32[2,2,128], index: 1, kind: input, shape index: {}]   ;;  %s917_s2 = inlined_call_operand.hbm [shape: f32[2,1,2,2,128], index: 2, kind: output, shape index: {}]  }
   0x1   :  { %9 = vsyncpa [#allocation3 + $0x1], 0 }
   0x2   :  { %10 = vsyncpa [#allocation6], 0 }
   0x3   :  { %12 = vsyncpa [#allocation6 + $0x1], 0 }
   0x4   :  { %13 = vsyncpa [#allocation4], 0 }
   0x5   :  { %15 = vsyncpa [#allocation4 + $0x1], 0  ;;  %s678_s9 = smov 0   ;;  %s680_s10 = smov 0  }
   0x6   :  { %s682_s11 = smov 0   ;;  %s684_s12 = smov 0  }
   0x7   :  { %s686_s13 = smov 0   ;;  %s688_s14 = smov 0  }
   0x8 LB: > { %s403_s15 = sadd.s32 4294967295, %s653_s14   ;;  %s404_s16 = sadd.s32 4294967294, %s653_s14   ;;  %s653_s14 = sphi %s688_s14, %s21_s14   ;;  %s649_s13 = sphi %s686_s13, %s936_s13   ;;  %s645_s12 = sphi %s684_s12, %s935_s12   ;;  %s641_s11 = sphi %s682_s11, %s934_s11   ;;  %s637_s10 = sphi %s680_s10, %s933_s10   ;;  %s633_s9 = sphi %s678_s9, %s932_s9  }
   0x9   : > { %s33_s17 = sadd.s32 1, %s649_s13  ;;  %s42_s18 = sadd.s32 1, %s641_s11 }
   0xa   : > { %p35_p0 = scmp.ge.s32.totalorder %s33_s17, 2  ;;  %p49_p1 = scmp.ne.s32.totalorder %s641_s11, %s637_s10 }
   0xb   : > { %p50_p2 = scmp.eq.s32.totalorder %s653_s14, 0  ;;  %p55_p3 = scmp.ne.s32.totalorder %s637_s10, %s633_s9 }
   0xc   : > { %s938_s17 = smov (%p35_p0, %s33_s17), 0  ;;  %p56_p5 = scmp.eq.s32.totalorder %s403_s15, 0 }
   0xd   : > { %p719_p4 = por %p50_p2, %p49_p1  ;;  %s37_s20 = ssub.s32 %s649_s13, %s938_s17 }
   0xe   : > { %p109_p6 = scmp.eq.s32.totalorder %s403_s15, 1  ;;  %p40_p7 = scmp.eq.s32.totalorder %s37_s20, 0 }
   0xf   : > { %p725_p8 = por %p56_p5, %p55_p3  ;;  %p115_p10 = scmp.eq.s32.totalorder %s404_s16, 1 }
  0x10   : > { %p729_p9 = por %p109_p6, %p49_p1  ;;  %p442_p13 = scmp.lt.s32.totalorder %s653_s14, 2 }
  0x11   : > { %s921_s21 = scalar_select %p725_p8, 1, 0 }
  0x12   : > { %s922_s22 = scalar_select %p729_p9, 1, 0 }
  0x13   : > { %s734_s23 = scalar_select %p40_p7, %s641_s11, %s42_s18  }
  0x14   : > { %p736_p11 = por %p115_p10, %p55_p3  ;;  %s743_s25 = sand.u32 1, %s641_s11  }
  0x15   : > { %s407_s26 = sshll.u32 %s743_s25, 3  ;;  %s423_s27 = sshll.u32 %s649_s13, 7 }
  0x16   : > { %s923_s24 = scalar_select %p736_p11, 1, 0 }
  0x17   : > { %s750_s30 = scalar_lea.hbm %s915_s0, %s423_s27  ;;  %s139_s3 = scalar_lea.vmem [#allocation2], %s407_s26 }
  0x18   : > { %s147_s4 = sshll.u32 %s139_s3, 4  ;;  %p756_p0 = pnand %p442_p13, %p719_p4  ;;  %s752_s4 = int_to_ptr.vmem [resolvable:$true] %s147_s4 }
  0x19   : > { %s136_s6 = scalar_lea.sflag [#allocation3], %s743_s25  ;;  %s507_s7 = scalar_lea.hbm %s750_s30, 128 }
  0x1a   : > { %p508_p2 = scmp.ne.s32.totalorder %s750_s30, %s507_s7  ;;  %p509_p3 = pneg %p756_p0 }
  0x1b   : > { %s512_s16 = scalar_lea.hbm %s915_s0, 256  ;;  %p513_p4 = scmp.lt.u32.totalorder %s750_s30, %s915_s0 }
  0x1c   : > { %p510_p5 = pnand %p509_p3, %p508_p2  ;;  %p514_p7 = scmp.lt.u32.totalorder %s512_s16, %s507_s7 }
  0x1d   : > { %p516_p13 = scmp.lt.u32.totalorder %s507_s7, %s750_s30 }
  0x1e   : > { %p511_p6 = pneg %p510_p5  ;;  %p515_p10 = por %p514_p7, %p513_p4 }
  0x20   : > { %p517_p12 = por %p516_p13, %p515_p10 }
  0x22   : > { %p518_p1 = pnand %p517_p12, %p511_p6 }
  0x24   : > { %521 = shalt.err (!%p518_p1)
}
  0x25   : > { %s522_s20 = scalar_lea.vmem %s752_s4, 128  ;;  %s655_s26 = smov [#allocation2]  }
  0x26   : > { %p523_p2 = scmp.ne.s32.totalorder %s752_s4, %s522_s20  ;;  %s527_s27 = sshll.u32 %s655_s26, 4  ;;  %s528_s27 = int_to_ptr.vmem [resolvable:$false] %s527_s27 }
  0x27   : > { %s529_s28 = scalar_lea.vmem %s528_s27, 256  ;;  %p530_p9 = scmp.lt.s32.totalorder %s752_s4, %s528_s27 }
  0x28   : > { %p525_p5 = pnand %p523_p2, %p509_p3  ;;  %p531_p4 = scmp.lt.s32.totalorder %s529_s28, %s522_s20 }
  0x2a   : > { %p526_p11 = pneg %p525_p5  ;;  %p532_p7 = por %p531_p4, %p530_p9 }
  0x2c   : > { %p533_p10 = pnand %p532_p7, %p526_p11 }
  0x2e   : > { %536 = shalt.err (!%p533_p10)
}
  0x2f   : > { %s656_s29 = smov 32   ;;  %s657_s3 = smov 2  }
  0x30   : > { %434 = dma.hbm_to_vmem [thread:$0]  (!%p756_p0), %s750_s30, 128, %s752_s4, %s136_s6, %s656_s29, %s656_s29, %s657_s3  }
  0x31   : > { %p174_p12 = scmp.lt.s32.totalorder %s653_s14, 3  ;;  %s410_s7 = sshll.u32 %s743_s25, 1 }
  0x32   : > { %s411_s8 = sshll.u32 %s649_s13, 5  ;;  %p925_p9 = scmp.ge.s32.totalorder %s653_s14, 1 }
  0x33   : > { %s801_s19 = scalar_lea.hbm %s916_s1, %s411_s8  ;;  %s161_s20 = scalar_lea.vmem [#allocation5], %s410_s7 }
  0x34   : > { %p794_p11 = pnand %p925_p9, %p174_p12  ;;  %s169_s26 = sshll.u32 %s161_s20, 4  ;;  %s170_s26 = int_to_ptr.vmem [resolvable:$true] %s169_s26 }
  0x35   : > { %s158_s30 = scalar_lea.sflag [#allocation6], %s743_s25  ;;  %s537_s4 = scalar_lea.hbm %s801_s19, 32 }
  0x36   : > { %s926_s15 = scalar_select %p794_p11, 1, 0 }
  0x37   : > { %p538_p1 = scmp.ne.s32.totalorder %s801_s19, %s537_s4  ;;  %s542_s28 = scalar_lea.hbm %s916_s1, 64 }
  0x38   : > { %p543_p2 = scmp.lt.u32.totalorder %s801_s19, %s916_s1  ;;  %p544_p5 = scmp.lt.u32.totalorder %s542_s28, %s537_s4 }
  0x39   : > { %p540_p6 = pnand %p538_p1, %p509_p3  ;;  %p546_p7 = scmp.lt.u32.totalorder %s537_s4, %s801_s19 }
  0x3a   : > { %p545_p4 = por %p544_p5, %p543_p2 }
  0x3b   : > { %p541_p13 = pneg %p540_p6 }
  0x3c   : > { %p547_p10 = por %p546_p7, %p545_p4 }
  0x3e   : > { %p548_p12 = pnand %p547_p10, %p541_p13 }
  0x40   : > { %551 = shalt.err (!%p548_p12)
}
  0x41   : > { %s552_s25 = scalar_lea.vmem %s170_s26, 32  ;;  %s658_s7 = smov [#allocation5]  }
  0x42   : > { %p553_p9 = scmp.ne.s32.totalorder %s170_s26, %s552_s25  ;;  %s557_s8 = sshll.u32 %s658_s7, 4  ;;  %s558_s8 = int_to_ptr.vmem [resolvable:$false] %s557_s8 }
  0x43   : > { %s559_s16 = scalar_lea.vmem %s558_s8, 64  ;;  %p560_p8 = scmp.lt.s32.totalorder %s170_s26, %s558_s8 }
  0x44   : > { %p555_p1 = pnand %p553_p9, %p509_p3  ;;  %p561_p11 = scmp.lt.s32.totalorder %s559_s16, %s552_s25 }
  0x46   : > { %p556_p6 = pneg %p555_p1  ;;  %p562_p2 = por %p561_p11, %p560_p8 }
  0x48   : > { %p563_p5 = pnand %p562_p2, %p556_p6 }
  0x4a   : > { %566 = shalt.err (!%p563_p5)
}
  0x4b   : > { %437 = dma.hbm_to_vmem [thread:$0]  (!%p756_p0), %s801_s19, 32, %s170_s26, %s158_s30  }
  0x4c   : > { %p927_p13 = scmp.ne.s32.totalorder %s926_s15, 0 }
  0x4d   : > { %s826_s18 = sand.u32 (!%p927_p13), 1, %s637_s10   ;;  %p928_p3 = scmp.ne.s32.totalorder (!%p927_p13), %s921_s21, 0 }
  0x4e   : > { %178 = sbr.rel (%p927_p13) target bundleno = 152 (0x98), region = 28  ;;  %s413_s20 = sshll.u32 (!%p927_p13), %s826_s18, 3 }
  0x4f   : > { %s181_s4 = scalar_lea.sflag (!%p927_p13), [#allocation3], %s826_s18  ;;  %s184_s6 = scalar_lea.vmem (!%p927_p13), [#allocation2], %s413_s20 }
  0x55   : > { %620 = dma.done.wait (%p928_p3), %s181_s4, 128  }
  0x56   : > { %622 = vsyncadd (%p928_p3), %s181_s4, 4294967168  ;;  %s414_s5 = sshll.u32 %s826_s18, 1  ;;  %s190_s15 = scalar_lea.sflag [#allocation6], %s826_s18 }
  0x57   : > { %s193_s19 = scalar_lea.vmem [#allocation5], %s414_s5 }
  0x58   : > { %624 = dma.done.wait (%p928_p3), %s190_s15, 32  }
  0x59   : > { %626 = vsyncadd (%p928_p3), %s190_s15, 4294967264  ;;  %vm225_vm0 = vcmask 1041408   ;;  %v219_v0 = vld [vmem:[%s184_s6] sm:$0x3]  ;;  %v220_v1 = vld [vmem:[%s184_s6 + $0x2] sm:$0x3] }
  0x5a   : > { %v221_v2 = vld [vmem:[%s184_s6 + $0x4] sm:$0x3]  ;;  %s415_s26 = sshll.u32 %s826_s18, 2  ;;  %v222_v3 = vld [vmem:[%s184_s6 + $0x6] sm:$0x3]  ;;  %v226_v4 = vsel %vm225_vm0, %v219_v0, -inf }
  0x5b   : > { %v227_v5 = vsel %vm225_vm0, %v220_v1, -inf  ;;  %v223_v6 = vld [vmem:[%s193_s19] sm:$0x3]  ;;  %v228_v7 = vsel %vm225_vm0, %v221_v2, -inf  ;;  %v229_v8 = vsel %vm225_vm0, %v222_v3, -inf  ;;  %v659_v12 = vmov 0.0  }
  0x5c   : > { %v230_v9 = vmax.f32 %v226_v4, %v227_v5  ;;  %vm224_vm1 = vcmp.ne.s32.totalorder %v223_v6, 4294967295  ;;  %v231_v10 = vmax.f32 %v228_v7, %v229_v8  ;;  %s846_s21 = scalar_lea.vmem [#allocation7], %s415_s26  ;;  %vm255_vm2 = vcmp.eq.s32.totalorder %v223_v6, 0  ;;  %s424_s27 = sshll.u32 %s645_s12, 6 }
  0x5d   : > { %v416_v13 = vsel %vm224_vm1, 1.0, %v659_v12  ;;  %vm256_vm3 = vcmp.eq.s32.totalorder %v223_v6, 1  ;;  %v259_v32 = vsel %vm255_vm2, %v219_v0, 0.0  ;;  %vm257_vm4 = vcmp.eq.s32.totalorder %v223_v6, 2  ;;  %s293_s30 = sshll.u32 %s846_s21, 4  ;;  %s864_s3 = scalar_lea.hbm %s917_s2, %s424_s27  ;;  %s859_s30 = int_to_ptr.vmem [resolvable:$true] %s293_s30 }
  0x5e   : > { %v232_v11 = vmax.f32 %v230_v9, %v231_v10  ;;  %417 = vst [vmem:[%s846_s21 + $0x2] sm:$0x3] %v416_v13  ;;  %v260_v33 = vsel %vm256_vm3, %v220_v1, 0.0  ;;  %v263_v35 = vsel %vm225_vm0, %v259_v32, 0.0  ;;  %v261_v37 = vsel %vm257_vm4, %v221_v2, 0.0  ;;  %s278_s25 = scalar_lea.sflag [#allocation4], %s826_s18 }
  0x5f   : > { %v264_v36 = vsel %vm225_vm0, %v260_v33, 0.0  ;;  %vm258_vm5 = vcmp.eq.s32.totalorder %v223_v6, 3  ;;  %v266_v39 = vsel %vm225_vm0, %v261_v37, 0.0  ;;  %s567_s7 = scalar_lea.vmem %s859_s30, 64  ;;  %p929_p0 = scmp.ne.s32.totalorder %s922_s22, 0 }
  0x60   : > { %v233_v14 = vsub.f32 %v219_v0, %v232_v11  ;;  %v234_v15 = vsub.f32 %v220_v1, %v232_v11  ;;  %v235_v16 = vsub.f32 %v221_v2, %v232_v11  ;;  %v236_v17 = vsub.f32 %v222_v3, %v232_v11  ;;  %p568_p8 = scmp.ne.s32.totalorder %s859_s30, %s567_s7  ;;  %s660_s12 = smov [#allocation7]  }
  0x61   : > { %v265_v38 = vadd.f32 %v264_v36, %v263_v35  ;;  %v262_v40 = vsel %vm258_vm5, %v222_v3, 0.0  ;;  %s571_s8 = sshll.u32 %s660_s12, 4  ;;  %s572_s8 = int_to_ptr.vmem [resolvable:$false] %s571_s8 }
  0x62   : > { %v237_v18 = vmul.f32 1.442695, %v233_v14  ;;  %v239_v19 = vmul.f32 1.442695, %v234_v15  ;;  %v241_v20 = vmul.f32 1.442695, %v235_v16  ;;  %p569_p11 = pnand %p568_p8, %p929_p0  ;;  %p574_p7 = scmp.lt.s32.totalorder %s859_s30, %s572_s8 }
  0x63   : > { %v243_v21 = vmul.f32 1.442695, %v236_v17  ;;  %v267_v41 = vadd.f32 %v266_v39, %v265_v38  ;;  %v268_v42 = vsel %vm225_vm0, %v262_v40, 0.0  ;;  %s573_s16 = scalar_lea.vmem %s572_s8, 128 }
  0x64   : > { %497 = vpow2.f32 %v237_v18  ;;  %p570_p4 = pneg %p569_p11  ;;  %p575_p10 = scmp.lt.s32.totalorder %s573_s16, %s567_s7 }
  0x65   : > { %499 = vpow2.f32 %v239_v19  ;;  %v269_v45 = vadd.f32 %v268_v42, %v267_v41 }
  0x66   : > { %501 = vpow2.f32 %v241_v20  ;;  %p576_p12 = por %p575_p10, %p574_p7 }
  0x67   : > { %503 = vpow2.f32 %v243_v21 }
  0x68   : > { %p577_p9 = pnand %p576_p12, %p570_p4 }
  0x6e   : > { %v498_v22 = vpop.eup %497 }
  0x6f   : > { %v500_v23 = vpop.eup %499  ;;  %v245_v24 = vsel %vm225_vm0, %v498_v22, 0.0 }
  0x70   : > { %v502_v25 = vpop.eup %501  ;;  %v246_v26 = vsel %vm225_vm0, %v500_v23, 0.0 }
  0x71   : > { %v504_v27 = vpop.eup %503  ;;  %v247_v28 = vadd.f32 %v246_v26, %v245_v24  ;;  %v248_v29 = vsel %vm225_vm0, %v502_v25, 0.0 }
  0x72   : > { %v250_v30 = vsel %vm225_vm0, %v504_v27, 0.0 }
  0x73   : > { %v249_v31 = vadd.f32 %v248_v29, %v247_v28 }
  0x75   : > { %v251_v34 = vadd.f32 %v250_v30, %v249_v31 }
  0x77   : > { %505 = vlog2.f32 %v251_v34 }
  0x81   : > { %v506_v43 = vpop.eup %505 }
  0x82   : > { %v253_v44 = vmul.f32 0.6931472, %v506_v43 }
  0x84   : > { %v254_v46 = vadd.f32 %v253_v44, %v232_v11 }
  0x86   : > { %v270_v47 = vsub.f32 %v254_v46, %v269_v45 }
  0x88   : > { %v271_v48 = vsel %vm224_vm1, %v270_v47, 0.0 }
  0x89   : > { %274 = vst [vmem:[%s846_s21] sm:$0x3] %v271_v48 }
  0x8a   : > { %580 = shalt.err (!%p577_p9)
}
  0x8b   : > { %s581_s20 = scalar_lea.hbm %s864_s3, 64  ;;  %s585_s5 = scalar_lea.hbm %s917_s2, 128 }
  0x8c   : > { %p582_p1 = scmp.ne.s32.totalorder %s864_s3, %s581_s20  ;;  %p586_p5 = scmp.lt.u32.totalorder %s864_s3, %s917_s2 }
  0x8d   : > { %p587_p13 = scmp.lt.u32.totalorder %s585_s5, %s581_s20  ;;  %p589_p8 = scmp.lt.u32.totalorder %s581_s20, %s864_s3 }
  0x8e   : > { %p583_p6 = pnand %p582_p1, %p929_p0 }
  0x8f   : > { %p588_p3 = por %p587_p13, %p586_p5 }
  0x90   : > { %p584_p2 = pneg %p583_p6 }
  0x91   : > { %p590_p11 = por %p589_p8, %p588_p3 }
  0x93   : > { %p591_p4 = pnand %p590_p11, %p584_p2 }
  0x95   : > { %594 = shalt.err (!%p591_p4)
}
  0x96   : > { %s661_s26 = smov 32   ;;  %s662_s21 = smov 2  }
  0x97   : > { %429 = dma.vmem_to_hbm [thread:$0]  (%p929_p0), %s859_s30, 64, %s864_s3, %s278_s25, %s661_s26, %s661_s26, %s662_s21  }
  0x98 PF: > { %s308_s27 = sand.u32 1, %s633_s9   ;;  %p930_p7 = scmp.ne.s32.totalorder %s923_s24, 0 }
  0x99   : > { %p931_p10 = scmp.ge.s32.totalorder %s653_s14, 2  ;;  %s309_s28 = scalar_lea.sflag [#allocation4], %s308_s27 }
  0x9b   : > { %p439_p12 = pnand %p931_p10, %p930_p7 }
  0x9d   : > { %628 = dma.done.wait (!%p439_p12), %s309_s28, 64  }
  0x9e   : > { %630 = vsyncadd (!%p439_p12), %s309_s28, 4294967232  ;;  %s21_s14 = sadd.s32 1, %s653_s14   ;;  %s932_s9 = smov %s637_s10 }
  0x9f   : > { %p18_p9 = scmp.ge.s32.totalorder %s21_s14, 4   ;;  %s933_s10 = smov %s641_s11 }
  0xa0   : > { %s934_s11 = smov %s734_s23  ;;  %s935_s12 = smov %s649_s13 }
  0xa1   : > { %s936_s13 = smov %s938_s17  ;;  %20 = sbr.rel (!%p18_p9) target bundleno = 8 (0x8), region = 87 }
  0xa8   :  { %314 = vsyncpa [#allocation3], 1 }
  0xa9   :  { %316 = vsyncpa [#allocation3 + $0x1], 1 }
  0xaa   :  { %317 = vsyncpa [#allocation6], 1 }
  0xab   :  { %319 = vsyncpa [#allocation6 + $0x1], 1 }
  0xac   :  { %320 = vsyncpa [#allocation4], 1 }
  0xad   :  { %322 = vsyncpa [#allocation4 + $0x1], 1 }

</bundles_post_ra>
